<compile_context>
chip_gen: v7x
topology: tpu7x:2x2x1
jax: 0.10.0
libtpu: 0.0.40
codegen_flags: <defaults>
</compile_context>

<pallas_src>
import jax
import jax.numpy as jnp
from jax.experimental import pallas as pl
from jax.experimental.pallas import tpu as pltpu


def _round_up(x, m):
    return ((x + m - 1) // m) * m


def _vq_kernel(z_ref, cb_ref, bias_ref, idx_ref):
    # z_ref   : (1, C, TS)   tile of z in channel-major layout (lanes = spatial)
    # cb_ref  : (Kp, C)      codebook pre-scaled by -2 (Kp = K padded to mult. of 8)
    # bias_ref: (Kp, 1)      ||e_k||^2  (+inf for padded rows)
    # idx_ref : (1, 1, TS)   int32 nearest-codeword index per spatial position
    z = z_ref[0]                                                      # (C, TS)
    # dist_k(n) = ||z_n||^2 - 2 e_k.z_n + ||e_k||^2 ; the ||z||^2 term is
    # constant over k and dropped (argmin-invariant).
    scores = jnp.dot(cb_ref[...], z,
                     preferred_element_type=jnp.float32)              # (Kp, TS)
    scores = scores + bias_ref[...]                                   # (Kp, TS)

    kp = scores.shape[0]
    min_val = jnp.min(scores, axis=0, keepdims=True)                  # (1, TS)
    k_iota = jax.lax.broadcasted_iota(jnp.int32, scores.shape, 0)     # (Kp, TS)
    idx = jnp.min(jnp.where(scores == min_val, k_iota, kp),
                  axis=0, keepdims=True)                              # (1, TS)
    idx_ref[...] = idx.reshape(idx_ref.shape).astype(jnp.int32)


def vq_indices_nchw(z_e_x, codebook, *, max_tile_s=2048):
    """z_e_x: (B, C, H, W) float32, codebook: (K, C) float32 -> (B, H, W) int32."""
    B, C, H, W = z_e_x.shape
    K, D = codebook.shape
    assert D == C, "codebook dim must equal channel dim"

    HW = H * W
    # Spatial tile: as large as practical, multiple of 128 lanes.
    tile_s = min(max_tile_s, _round_up(HW, 128))
    hw_pad = _round_up(HW, tile_s)
    s_tiles = hw_pad // tile_s

    # Free reshape — no NHWC transpose needed in this orientation.
    z = z_e_x.astype(jnp.float32).reshape(B, C, HW)
    if hw_pad != HW:
        z = jnp.pad(z, ((0, 0), (0, 0), (0, hw_pad - HW)))

    # Codebook-side work hoisted out of the grid loop (tiny, one-time).
    k_pad = _round_up(K, 8)
    cb32 = codebook.astype(jnp.float32)
    cb_m2 = -2.0 * cb32                                        # (K, C)
    e_sq = jnp.sum(cb32 * cb32, axis=1, keepdims=True)         # (K, 1)
    if k_pad != K:
        cb_m2 = jnp.pad(cb_m2, ((0, k_pad - K), (0, 0)))
        e_sq = jnp.pad(e_sq, ((0, k_pad - K), (0, 0)),
                       constant_values=jnp.inf)                # sentinels never win

    out = pl.pallas_call(
        _vq_kernel,
        out_shape=jax.ShapeDtypeStruct((B, s_tiles, tile_s), jnp.int32),
        grid_spec=pltpu.PrefetchScalarGridSpec(
            num_scalar_prefetch=0,
            grid=(B, s_tiles),
            in_specs=[
                # z tile: (1, C, tile_s), lanes = spatial positions
                pl.BlockSpec((1, C, tile_s), lambda b, s: (b, 0, s)),
                # whole (padded) codebook, constant index_map -> DMA'd once
                pl.BlockSpec((k_pad, C), lambda b, s: (0, 0)),
                # precomputed ||e||^2 bias, constant index_map
                pl.BlockSpec((k_pad, 1), lambda b, s: (0, 0)),
            ],
            # lane-dense index output: (1, 1, tile_s)
            out_specs=pl.BlockSpec((1, 1, tile_s), lambda b, s: (b, s, 0)),
        ),
        compiler_params=pltpu.CompilerParams(
            dimension_semantics=("parallel", "parallel"),
            vmem_limit_bytes=48 * 1024 * 1024,
        ),
    )(z, cb_m2, e_sq)

    idx = out.reshape(B, hw_pad)[:, :HW].reshape(B, H, W)
    return idx


class VQEmbedding:
    """JAX/Pallas port of the PyTorch VQEmbedding forward pass."""

    def __init__(self, K, D, key):
        # nn.Embedding(K, D) with weight.uniform_(-1/K, 1/K)
        self.K = K
        self.D = D
        self.weight = jax.random.uniform(
            key, (K, D), dtype=jnp.float32, minval=-1.0 / K, maxval=1.0 / K)

    def forward(self, z_e_x):
        # z_e_x: (B, C, H, W) NCHW, C == D -> latents (B, H, W) int32
        B, C, H, W = z_e_x.shape
        assert C == self.D
        return vq_indices_nchw(z_e_x, self.weight)


def _reference_vq(z_e_x, weight):
    # pure-JAX reference (mirrors torch: NHWC flatten + full expanded distance)
    B, C, H, W = z_e_x.shape
    z = jnp.transpose(z_e_x, (0, 2, 3, 1)).reshape(-1, C)
    d = (jnp.sum(z * z, 1, keepdims=True)
         - 2.0 * z @ weight.T
         + jnp.sum(weight * weight, 1)[None, :])
    return jnp.argmin(d, axis=1).reshape(B, H, W).astype(jnp.int32)


if __name__ == "__main__":
    key = jax.random.PRNGKey(0)
    k_emb, k_x = jax.random.split(key)

    K, D = 8, 4                        # small codebook, D == channels
    B, H, W = 2, 16, 16                # H*W = 256 (multiple of 128 lanes)

    module = VQEmbedding(K, D, k_emb)
    z_e_x = jax.random.normal(k_x, (B, D, H, W), dtype=jnp.float32)  # NCHW

    latents = module.forward(z_e_x)
    latents = jax.block_until_ready(latents)

    ref = _reference_vq(z_e_x, module.weight)
    assert latents.shape == (B, H, W)
    assert latents.dtype == jnp.int32
    assert bool(jnp.all(latents == ref)), "mismatch vs pure-JAX reference"

    print("KERNEL_OK")
</pallas_src>

<mosaic_0001>
module attributes {stable_mosaic.version = 11 : i64} {
  func.func @_vq_kernel(%arg0: i32, %arg1: i32, %arg2: memref<1x4x256xf32, #tpu.memory_space<vmem>>, %arg3: memref<8x4xf32, #tpu.memory_space<vmem>>, %arg4: memref<8x1xf32, #tpu.memory_space<vmem>>, %arg5: memref<1x1x256xi32, #tpu.memory_space<vmem>>) attributes {dimension_semantics = [#tpu.dimension_semantics<parallel>, #tpu.dimension_semantics<parallel>], iteration_bounds = array<i64: 2, 1>, scalar_prefetch = 0 : i64, scratch_operands = 0 : i64, tpu.core_type = #tpu.core_type<tc>, window_params = [{transform_indices = @transform_0, window_bounds = array<i64: 1, 4, 256>}, {pipeline_mode = #tpu.pipeline_mode<synchronous>, transform_indices = @transform_1, window_bounds = array<i64: 8, 4>}, {pipeline_mode = #tpu.pipeline_mode<synchronous>, transform_indices = @transform_2, window_bounds = array<i64: 8, 1>}, {transform_indices = @transform_3, window_bounds = array<i64: 1, 1, 256>}]} {
    %c0 = arith.constant 0 : index
    %c0_0 = arith.constant 0 : index
    %c0_1 = arith.constant 0 : index
    %0 = vector.load %arg2[%c0, %c0_0, %c0_1] : memref<1x4x256xf32, #tpu.memory_space<vmem>>, vector<1x4x256xf32>
    %1 = vector.shape_cast %0 : vector<1x4x256xf32> to vector<4x256xf32>
    %c0_2 = arith.constant 0 : index
    %c0_3 = arith.constant 0 : index
    %2 = vector.load %arg3[%c0_2, %c0_3] : memref<8x4xf32, #tpu.memory_space<vmem>>, vector<8x4xf32>
    %cst = arith.constant dense<0.000000e+00> : vector<8x256xf32>
    %3 = tpu.matmul %2, %1, %cst {dimension_numbers = #tpu.dot_dimension_numbers<[1], [0], [0], [1], [0, 0, 1, 1], [], []>} : vector<8x4xf32>, vector<4x256xf32>, vector<8x256xf32> -> vector<8x256xf32>
    %c0_4 = arith.constant 0 : index
    %c0_5 = arith.constant 0 : index
    %4 = vector.load %arg4[%c0_4, %c0_5] : memref<8x1xf32, #tpu.memory_space<vmem>>, vector<8x1xf32>
    %5 = vector.broadcast %4 : vector<8x1xf32> to vector<8x256xf32>
    %6 = arith.addf %3, %5 : vector<8x256xf32>
    %cst_6 = arith.constant dense<0x7F800000> : vector<256xf32>
    %7 = vector.multi_reduction <minimumf>, %6, %cst_6 [0] : vector<8x256xf32> to vector<256xf32>
    %8 = vector.shape_cast %7 : vector<256xf32> to vector<1x256xf32>
    %9 = tpu.iota {dimensions = array<i32: 0>} : vector<8x256xi32>
    %10 = vector.broadcast %8 : vector<1x256xf32> to vector<8x256xf32>
    %11 = arith.cmpf oeq, %6, %10 : vector<8x256xf32>
    %c8_i32 = arith.constant 8 : i32
    %12 = vector.broadcast %c8_i32 : i32 to vector<8x256xi32>
    %13 = arith.select %11, %9, %12 : vector<8x256xi1>, vector<8x256xi32>
    %cst_7 = arith.constant dense<2147483647> : vector<256xi32>
    %14 = vector.multi_reduction <minsi>, %13, %cst_7 [0] : vector<8x256xi32> to vector<256xi32>
    %15 = vector.shape_cast %14 : vector<256xi32> to vector<1x256xi32>
    %16 = vector.shape_cast %15 : vector<1x256xi32> to vector<1x1x256xi32>
    %c0_8 = arith.constant 0 : index
    %c0_9 = arith.constant 0 : index
    %c0_10 = arith.constant 0 : index
    %17 = vector.load %arg5[%c0_8, %c0_9, %c0_10] : memref<1x1x256xi32, #tpu.memory_space<vmem>>, vector<1x1x256xi32>
    tpu.vector_store %arg5[%c0_8, %c0_9, %c0_10], %16 {strides = array<i32>} : memref<1x1x256xi32, #tpu.memory_space<vmem>>, vector<1x1x256xi32>,
    return
  }
  func.func @transform_0(%arg0: i32, %arg1: i32) -> (i32, i32, i32) {
    %c0_i32 = arith.constant 0 : i32
    %c0_i32_0 = arith.constant 0 : i32
    return %arg0, %c0_i32, %arg1 : i32, i32, i32
  }
  func.func @transform_1(%arg0: i32, %arg1: i32) -> (i32, i32) {
    %c0_i32 = arith.constant 0 : i32
    %c0_i32_0 = arith.constant 0 : i32
    %c0_i32_1 = arith.constant 0 : i32
    return %c0_i32, %c0_i32_0 : i32, i32
  }
  func.func @transform_2(%arg0: i32, %arg1: i32) -> (i32, i32) {
    %c0_i32 = arith.constant 0 : i32
    %c0_i32_0 = arith.constant 0 : i32
    %c0_i32_1 = arith.constant 0 : i32
    return %c0_i32, %c0_i32_0 : i32, i32
  }
  func.func @transform_3(%arg0: i32, %arg1: i32) -> (i32, i32, i32) {
    %c0_i32 = arith.constant 0 : i32
    %c0_i32_0 = arith.constant 0 : i32
    return %arg0, %arg1, %c0_i32 : i32, i32, i32
  }
}

</mosaic_0001>

<bundles_post_ra>
// kernel: tpu_custom_call.1
= control target key start
LH: loop header
LB: loop body
LE: loop exit
PB: predicated region body
PF: predicated region fallthrough
CT: control target
= control target key end

     0   :  { %8 = vsyncpa [#allocation3], 0  ;;  %s738_s0 = inlined_call_operand.vmem [shape: f32[2,4,256], index: 0, kind: input, shape index: {}]   ;;  %s739_s1 = inlined_call_operand.vmem [shape: f32[8,4], index: 1, kind: input, shape index: {}]   ;;  %s740_s2 = inlined_call_operand.vmem [shape: f32[8,1], index: 2, kind: input, shape index: {}]   ;;  %s741_s3 = inlined_call_operand.hbm [shape: s32[2,1,256], index: 3, kind: output, shape index: {}]  }
   0x1   :  { %10 = vsyncpa [#allocation3 + $0x1], 0  ;;  %s620_s12 = smov 0   ;;  %s622_s13 = smov 0  }
   0x2   :  { %s624_s14 = smov 0   ;;  %s626_s15 = smov 0  }
   0x3   :  { %s628_s16 = smov 0   ;;  %s630_s17 = smov 0  }
   0x4 LB: > { %s438_s18 = sadd.s32 4294967295, %s594_s17   ;;  %s439_s19 = sadd.s32 4294967294, %s594_s17   ;;  %s594_s17 = sphi %s630_s17, %s16_s17   ;;  %s590_s16 = sphi %s628_s16, %s748_s16   ;;  %s586_s15 = sphi %s626_s15, %s747_s15   ;;  %s582_s14 = sphi %s624_s14, %s746_s14   ;;  %s578_s13 = sphi %s622_s13, %s745_s13   ;;  %s574_s12 = sphi %s620_s12, %s744_s12  }
   0x5   : > { %s28_s20 = sadd.s32 1, %s590_s16  ;;  %s107_s21 = sadd.s32 1, %s582_s14 }
   0x6   : > { %p30_p0 = scmp.ge.s32.totalorder %s28_s20, 2  ;;  %p117_p1 = scmp.ne.s32.totalorder %s582_s14, %s578_s13 }
   0x7   : > { %p118_p2 = scmp.eq.s32.totalorder %s438_s18, 1  ;;  %p123_p3 = scmp.ne.s32.totalorder %s578_s13, %s574_s12 }
   0x8   : > { %s750_s20 = smov (%p30_p0, %s28_s20), 0  ;;  %p124_p5 = scmp.eq.s32.totalorder %s439_s19, 1 }
   0x9   : > { %p660_p4 = por %p118_p2, %p117_p1  ;;  %s102_s23 = ssub.s32 %s590_s16, %s750_s20 }
   0xa   : > { %p442_p6 = scmp.ge.s32.totalorder %s594_s17, 1  ;;  %p105_p7 = scmp.eq.s32.totalorder %s102_s23, 0 }
   0xb   : > { %p667_p8 = por %p124_p5, %p123_p3  ;;  %p161_p9 = scmp.lt.s32.totalorder %s594_s17, 3 }
   0xc   : > { %s673_s25 = scalar_select %p105_p7, %s582_s14, %s107_s21  }
   0xd   : > { %p162_p10 = pnand %p442_p6, %p161_p9 }
   0xe   : > { %p190_p11 = scmp.lt.s32.totalorder (!%p162_p10), %s586_s15, 1  ;;  %v596_v0 = vmov (!%p162_p10), 0.0   ;;  %v597_v1 = vmov (!%p162_p10), 0   ;;  %v201_v2 = vld [vmem:[%s740_s2] sm:$0xff] (!%p162_p10)  ;;  %vm213_vm0 = vcmask (!%p162_p10), 1043456   ;;  %vm209_vm1 = vcmask (!%p162_p10), 31744  }
   0xf   : > { %165 = sbr.rel (%p162_p10) target bundleno = 292 (0x124), region = 32  ;;  %282 = vmatprep.mubr.f32.mxu0 (!%p162_p10), %v596_v0  ;;  %514 = vset.pattern.permute.xlu0 (!%p162_p10), %v597_v1  ;;  %v200_v5 = vld [vmem:[%s739_s1] sm:$0xff] (!%p162_p10)  ;;  %v301_v16 = vlaneseq (!%p162_p10)  ;;  %v598_v30 = vmov (!%p162_p10), 1966171168   ;;  %s186_s8 = sand.u32 (!%p162_p10), 1, %s578_s13  }
  0x10   : > { %204 = vperm.xlu0 (!%p162_p10), %514, %v201_v2   ;;  %v327_v31 = vunpack.c.l.s4 (!%p162_p10), %v598_v30  ;;  %s443_s9 = sshll.u32 (!%p162_p10), %s186_s8, 1  ;;  %s455_s10 = sshll.u32 (!%p162_p10), %s586_s15, 5 }
  0x11   : > { %v302_v21 = vshrl.u32 (!%p162_p10), %v301_v16, 7  ;;  %s188_s11 = scalar_lea.vmem (!%p162_p10), [#allocation2], %s443_s9  ;;  %vm342_vm10 = vcmp.lt.s32.totalorder (!%p162_p10), %v301_v16, 256  ;;  %s691_s23 = scalar_lea.hbm (!%p162_p10), %s741_s3, %s455_s10 }
  0x12   : > { %v328_v36 = vunpack.c.0.s8 (!%p162_p10), %v327_v31  ;;  %s362_s18 = sshll.u32 (!%p162_p10), %s188_s11, 4  ;;  %s346_s26 = scalar_lea.sflag (!%p162_p10), [#allocation3], %s186_s8  ;;  %s693_s18 = int_to_ptr.vmem [resolvable:$true] %s362_s18 }
  0x13   : > { %s516_s27 = scalar_lea.vmem (!%p162_p10), %s693_s18, 32 }
  0x14   : > { %v331_v41 = vsub.s32 (!%p162_p10), %v328_v36, %v302_v21  ;;  %p517_p12 = scmp.ne.s32.totalorder (!%p162_p10), %s693_s18, %s516_s27 }
  0x16   : > { %s191_s28 = scalar_select %p190_p11, %s586_s15, 1 }
  0x17   : > { %p518_p13 = pnand %p517_p12, %p660_p4  ;;  %s599_s15 = smov [#allocation2]  }
  0x18   : > { %s454_s29 = sshll.u32 %s191_s28, 3  ;;  %s520_s28 = sshll.u32 %s599_s15, 4  ;;  %s521_s28 = int_to_ptr.vmem [resolvable:$false] %s520_s28 }
  0x19   : > { %s197_s5 = scalar_lea.vmem %s738_s0, %s454_s29  ;;  %p519_p0 = pneg %p518_p13 }
  0x1a   : > { %v199_v3 = vld [vmem:[%s197_s5] sm:$0xff]  ;;  %s522_s29 = scalar_lea.vmem %s521_s28, 64  ;;  %p523_p1 = scmp.lt.s32.totalorder %s693_s18, %s521_s28 }
  0x1b   : > { %v208_v4 = vcombine.high %v199_v3, %v199_v3  ;;  %p524_p2 = scmp.lt.s32.totalorder %s522_s29, %s516_s27 }
  0x1d   : > { %446 = vmatprep.subr.msk.mxu0 %vm213_vm0, %v208_v4  ;;  %p525_p3 = por %p524_p2, %p523_p1 }
  0x1e   : > { %447 = vmatpush1.msk.msra.mxu0 %vm213_vm0, %v199_v3 }
  0x1f   : > { %448 = vmatmul.mubr.msk.f32.vlgmr.msra.gmra.mrb[0].mxu0 %vm209_vm1, %v200_v5  ;;  %p526_p5 = pnand %p525_p3, %p519_p0 }
  0x8f   : > { %v205_v6 = vpop.permute.xlu0 %204 }
  0xf2   : > { %v284_v7 = vpop.f32.mrb[0].mxu0 }
  0xf3   : > { %v285_v8 = vadd.f32 %v284_v7, %v205_v6  ;;  %v286_v9 = vpop.f32.mrb[1].mxu0 }
  0xf4   : > { %v287_v10 = vadd.f32 %v286_v9, %v205_v6 }
  0xf5   : > { %v289_v11 = vrot.slane %v285_v8, 4 }
  0xf6   : > { %v295_v12 = vrot.slane %v287_v10, 4 }
  0xf7   : > { %v290_v13 = vmin.f32 %v285_v8, %v289_v11 }
  0xf8   : > { %v296_v14 = vmin.f32 %v287_v10, %v295_v12 }
  0xf9   : > { %v291_v15 = vrot.slane %v290_v13, 2 }
  0xfa   : > { %v297_v17 = vrot.slane %v296_v14, 2 }
  0xfb   : > { %v292_v18 = vmin.f32 %v290_v13, %v291_v15 }
  0xfc   : > { %v298_v19 = vmin.f32 %v296_v14, %v297_v17 }
  0xfd   : > { %v293_v20 = vrot.slane %v292_v18, 1 }
  0xfe   : > { %v299_v22 = vrot.slane %v298_v19, 1 }
  0xff   : > { %v294_v23 = vmin.f32 %v292_v18, %v293_v20 }
 0x100   : > { %v300_v24 = vmin.f32 %v298_v19, %v299_v22 }
 0x101   : > { %vm303_vm2 = vcmp.eq.f32.partialorder %v285_v8, %v294_v23 }
 0x102   : > { %v305_v25 = vsel %vm303_vm2, %v302_v21, 8  ;;  %vm304_vm3 = vcmp.eq.f32.partialorder %v287_v10, %v300_v24 }
 0x103   : > { %v307_v26 = vrot.slane %v305_v25, 4  ;;  %v306_v27 = vsel %vm304_vm3, %v302_v21, 8 }
 0x104   : > { %v316_v28 = vrot.slane %v306_v27, 4 }
 0x105   : > { %vm308_vm4 = vcmp.lt.s32.totalorder %v305_v25, %v307_v26 }
 0x106   : > { %v309_v29 = vsel %vm308_vm4, %v305_v25, %v307_v26  ;;  %vm317_vm5 = vcmp.lt.s32.totalorder %v306_v27, %v316_v28 }
 0x107   : > { %v310_v32 = vrot.slane %v309_v29, 2  ;;  %v318_v33 = vsel %vm317_vm5, %v306_v27, %v316_v28 }
 0x108   : > { %v319_v34 = vrot.slane %v318_v33, 2 }
 0x109   : > { %vm311_vm6 = vcmp.lt.s32.totalorder %v309_v29, %v310_v32 }
 0x10a   : > { %v312_v35 = vsel %vm311_vm6, %v309_v29, %v310_v32  ;;  %vm320_vm7 = vcmp.lt.s32.totalorder %v318_v33, %v319_v34 }
 0x10b   : > { %v313_v37 = vrot.slane %v312_v35, 1  ;;  %v321_v38 = vsel %vm320_vm7, %v318_v33, %v319_v34 }
 0x10c   : > { %v322_v39 = vrot.slane %v321_v38, 1 }
 0x10d   : > { %vm314_vm8 = vcmp.lt.s32.totalorder %v312_v35, %v313_v37 }
 0x10e   : > { %v315_v40 = vsel %vm314_vm8, %v312_v35, %v313_v37  ;;  %vm323_vm9 = vcmp.lt.s32.totalorder %v321_v38, %v322_v39 }
 0x10f   : > { %v324_v42 = vsel %vm323_vm9, %v321_v38, %v322_v39 }
 0x110   : > { %v325_v43 = vcombine.low %v315_v40, %v324_v42 }
 0x112   : > { %v332_v44 = vrot.slane %v325_v43, %v331_v41 }
 0x114   : > { %v339_v45 = vrot.slane %v332_v44, %v331_v41 }
 0x116   : > { %344 = vst.msk [vmem:[%s188_s11] sm:$0x3] %vm342_vm10, %v339_v45 }
 0x117   : > { %529 = shalt.err (!%p526_p5)
}
 0x118   : > { %s530_s30 = scalar_lea.hbm %s691_s23, 32  ;;  %s534_s6 = scalar_lea.hbm %s741_s3, 64 }
 0x119   : > { %p531_p6 = scmp.ne.s32.totalorder %s691_s23, %s530_s30  ;;  %p535_p10 = scmp.lt.u32.totalorder %s691_s23, %s741_s3 }
 0x11a   : > { %p536_p11 = scmp.lt.u32.totalorder %s534_s6, %s530_s30  ;;  %p538_p13 = scmp.lt.u32.totalorder %s530_s30, %s691_s23 }
 0x11b   : > { %p532_p7 = pnand %p531_p6, %p660_p4 }
 0x11c   : > { %p537_p12 = por %p536_p11, %p535_p10 }
 0x11d   : > { %p533_p9 = pneg %p532_p7 }
 0x11e   : > { %p539_p0 = por %p538_p13, %p537_p12 }
 0x120   : > { %p540_p1 = pnand %p539_p0, %p533_p9 }
 0x122   : > { %543 = shalt.err (!%p540_p1)
}
 0x123   : > { %456 = dma.vmem_to_hbm [thread:$0]  (%p660_p4), %s693_s18, 32, %s691_s23, %s346_s26  }
 0x124 PF: > { %p462_p2 = scmp.ge.s32.totalorder %s594_s17, 2  ;;  %s374_s9 = sand.u32 1, %s574_s12  }
 0x125   : > { %s375_s10 = scalar_lea.sflag [#allocation3], %s374_s9 }
 0x126   : > { %p459_p3 = pnand %p462_p2, %p667_p8 }
 0x128   : > { %569 = dma.done.wait (!%p459_p3), %s375_s10, 32  }
 0x129   : > { %571 = vsyncadd (!%p459_p3), %s375_s10, 4294967264  ;;  %s16_s17 = sadd.s32 1, %s594_s17   ;;  %s744_s12 = smov %s578_s13 }
 0x12a   : > { %p13_p5 = scmp.ge.s32.totalorder %s16_s17, 4   ;;  %s745_s13 = smov %s582_s14 }
 0x12b   : > { %s746_s14 = smov %s673_s25  ;;  %s747_s15 = smov %s590_s16 }
 0x12c   : > { %s748_s16 = smov %s750_s20  ;;  %15 = sbr.rel (!%p13_p5) target bundleno = 4 (0x4), region = 67 }
 0x133   :  { %380 = vsyncpa [#allocation3], 1 }
 0x134   :  { %382 = vsyncpa [#allocation3 + $0x1], 1 }

</bundles_post_ra>
